<compile_context>
chip_gen: v7x
topology: tpu7x:2x2x1
jax: 0.10.0
libtpu: 0.0.40
codegen_flags: <defaults>
</compile_context>

<pallas_src>
import functools

import jax
import jax.numpy as jnp
from jax.experimental import pallas as pl
from jax.experimental.pallas import tpu as pltpu


def _round_up(x, m):
    return ((x + m - 1) // m) * m


def _pick_out_tile(hw_pad, cap=512):
    """Largest multiple of 128 that divides hw_pad and is <= cap."""
    t = min(cap, hw_pad)
    t = (t // 128) * 128
    while t > 128 and hw_pad % t != 0:
        t -= 128
    return max(t, 128)


def _rotate_kernel(x_ref, st_ref, o_ref, *, three_pass):
    """Gather-as-matmul on the MXU:  out_block = x_block @ S_T_block.

    x_ref  : VMEM (bm, HW_pad)     input rows (flattened spatial on lanes)
    st_ref : VMEM (HW_pad, T_out)  bf16 one-hot selection tile (prebuilt)
    o_ref  : VMEM (bm, T_out)      output rows for this output-pixel tile
    """
    st = st_ref[...]                                         # bf16 0/1 tile
    if three_pass:
        # Exact one-sided 3-chunk bf16 split of x (S_T is exact in bf16, so
        # no cross terms are lost; each output selects a single source value).
        xf = x_ref[...].astype(jnp.float32)
        x0 = xf.astype(jnp.bfloat16)
        r1 = xf - x0.astype(jnp.float32)
        x1 = r1.astype(jnp.bfloat16)
        r2 = r1 - x1.astype(jnp.float32)
        x2 = r2.astype(jnp.bfloat16)
        out = jnp.dot(x0, st, preferred_element_type=jnp.float32)
        out = out + jnp.dot(x1, st, preferred_element_type=jnp.float32)
        out = out + jnp.dot(x2, st, preferred_element_type=jnp.float32)
    else:
        # bf16 input: a single native pass is already exact for a 0/1 select.
        out = jnp.dot(x_ref[...], st, preferred_element_type=jnp.float32)
    o_ref[...] = out.astype(o_ref.dtype)


def _build_selection_matrix(angle_rad, H, W, HW_pad):
    """S_T[s, o] = 1 iff source pixel s feeds output pixel o (bf16, padded)."""
    HW = H * W
    cos_a = jnp.cos(angle_rad).astype(jnp.float32)
    sin_a = jnp.sin(angle_rad).astype(jnp.float32)

    o_idx = jnp.arange(HW_pad, dtype=jnp.float32)            # flattened out pix
    oy = jnp.floor(o_idx / float(W))
    ox = o_idx - oy * float(W)

    cx = (W - 1) * 0.5
    cy = (H - 1) * 0.5

    # Inverse affine map (rotate output coords back into the source image).
    dx = ox - cx
    dy = oy - cy
    src_x = cos_a * dx + sin_a * dy + cx
    src_y = -sin_a * dx + cos_a * dy + cy

    # Nearest-neighbor rounding (floor(x + 0.5)).
    sxr = jnp.floor(src_x + 0.5)
    syr = jnp.floor(src_y + 0.5)

    valid = ((sxr >= 0) & (sxr < W) & (syr >= 0) & (syr < H)
             & (o_idx < float(HW)))                          # kill padded cols
    src_flat = (syr * float(W) + sxr).astype(jnp.int32)      # (HW_pad,)

    rows = jnp.arange(HW_pad, dtype=jnp.int32)[:, None]      # (HW_pad, 1)
    st = ((rows == src_flat[None, :]) & valid[None, :])
    return st.astype(jnp.bfloat16)                           # (HW_pad, HW_pad)


def rotate(x, angle_rad):
    """x: [N, C, H, W]; angle_rad: python/JAX scalar (radians)."""
    N, C, H, W = x.shape
    HW = H * W
    HW_pad = _round_up(HW, 128)          # lane-dense spatial axis
    M = N * C
    bm = min(512, _round_up(M, 8))       # rows per grid step (sublane-dense)
    M_pad = _round_up(M, bm)
    tn = _pick_out_tile(HW_pad)          # output-pixel tile, multiple of 128

    # Selection matrix built once on the host side of the kernel (plain JAX).
    st = _build_selection_matrix(angle_rad, H, W, HW_pad)

    xf = x.reshape(M, HW)
    if (M_pad, HW_pad) != (M, HW):
        xf = jnp.pad(xf, ((0, M_pad - M), (0, HW_pad - HW)))

    three_pass = (x.dtype != jnp.bfloat16)

    # Explicit VMEM budget: x block + S_T tile + out block (double-buffered)
    # plus in-kernel split temporaries; only raise the limit when needed.
    itemsize = jnp.dtype(x.dtype).itemsize
    est = 2 * (bm * HW_pad * itemsize            # x blocks
               + HW_pad * tn * 2                 # S_T tiles (bf16)
               + bm * tn * itemsize)             # output blocks
    est += bm * HW_pad * 16 + bm * tn * 8 + (2 << 20)   # temps + slack
    vmem_limit = min(est, 64 << 20) if est > (32 << 20) else None

    out = pl.pallas_call(
        functools.partial(_rotate_kernel, three_pass=three_pass),
        out_shape=jax.ShapeDtypeStruct((M_pad, HW_pad), x.dtype),
        grid=(M_pad // bm, HW_pad // tn),
        in_specs=[
            pl.BlockSpec((bm, HW_pad), lambda m, j: (m, 0)),   # x rows
            pl.BlockSpec((HW_pad, tn), lambda m, j: (0, j)),   # S_T tile
        ],
        out_specs=pl.BlockSpec((bm, tn), lambda m, j: (m, j)),
        compiler_params=pltpu.CompilerParams(
            # All grid points are independent -> both axes parallel
            # (lets v7x shard across its two TensorCores).
            dimension_semantics=("parallel", "parallel"),
            vmem_limit_bytes=vmem_limit),
    )(xf, st)

    return out[:M, :HW].reshape(N, C, H, W)


def _rotate_ref(x, angle_rad):
    """Plain-JAX reference of the same nearest-neighbor rotation."""
    N, C, H, W = x.shape
    cos_a, sin_a = jnp.cos(angle_rad), jnp.sin(angle_rad)
    oy, ox = jnp.meshgrid(jnp.arange(H, dtype=jnp.float32),
                          jnp.arange(W, dtype=jnp.float32), indexing="ij")
    cx, cy = (W - 1) * 0.5, (H - 1) * 0.5
    dx, dy = ox - cx, oy - cy
    sx = jnp.floor(cos_a * dx + sin_a * dy + cx + 0.5)
    sy = jnp.floor(-sin_a * dx + cos_a * dy + cy + 0.5)
    valid = (sx >= 0) & (sx < W) & (sy >= 0) & (sy < H)
    sxc = jnp.clip(sx, 0, W - 1).astype(jnp.int32)
    syc = jnp.clip(sy, 0, H - 1).astype(jnp.int32)
    gathered = x[:, :, syc, sxc]                       # [N, C, H, W]
    return jnp.where(valid[None, None], gathered, 0.0).astype(x.dtype)


if __name__ == "__main__":
    key = jax.random.PRNGKey(0)
    k_img, k_ang = jax.random.split(key)

    N, C, H, W = 2, 4, 16, 16
    x = jax.random.normal(k_img, (N, C, H, W), dtype=jnp.float32)

    # Random angle in [-30, 30] degrees (deterministic), as RandomAffine(degrees=30).
    deg = jax.random.uniform(k_ang, (), minval=-30.0, maxval=30.0)
    angle = deg * (jnp.pi / 180.0)

    out = rotate(x, angle)
    jax.block_until_ready(out)

    # Sanity: kernel matches the plain-JAX reference, and angle=0 is identity.
    ref = _rotate_ref(x, angle)
    assert jnp.allclose(out, ref, atol=1e-5), "mismatch vs reference rotation"
    ident = rotate(x, jnp.float32(0.0))
    assert jnp.allclose(ident, x, atol=1e-5), "angle=0 should be identity"

    print("KERNEL_OK")
</pallas_src>

<mosaic_0001>
module attributes {stable_mosaic.version = 11 : i64} {
  func.func @_rotate_kernel(%arg0: i32, %arg1: i32, %arg2: memref<8x256xf32, #tpu.memory_space<vmem>>, %arg3: memref<256x256xbf16, #tpu.memory_space<vmem>>, %arg4: memref<8x256xf32, #tpu.memory_space<vmem>>) attributes {dimension_semantics = [#tpu.dimension_semantics<parallel>, #tpu.dimension_semantics<parallel>], iteration_bounds = array<i64: 1, 1>, scalar_prefetch = 0 : i64, scratch_operands = 0 : i64, tpu.core_type = #tpu.core_type<tc>, window_params = [{transform_indices = @transform_0, window_bounds = array<i64: 8, 256>}, {transform_indices = @transform_1, window_bounds = array<i64: 256, 256>}, {transform_indices = @transform_2, window_bounds = array<i64: 8, 256>}]} {
    %c0 = arith.constant 0 : index
    %c0_0 = arith.constant 0 : index
    %0 = vector.load %arg3[%c0, %c0_0] : memref<256x256xbf16, #tpu.memory_space<vmem>>, vector<256x256xbf16>
    %c0_1 = arith.constant 0 : index
    %c0_2 = arith.constant 0 : index
    %1 = vector.load %arg2[%c0_1, %c0_2] : memref<8x256xf32, #tpu.memory_space<vmem>>, vector<8x256xf32>
    %2 = arith.truncf %1 : vector<8x256xf32> to vector<8x256xbf16>
    %3 = arith.extf %2 : vector<8x256xbf16> to vector<8x256xf32>
    %4 = arith.subf %1, %3 : vector<8x256xf32>
    %5 = arith.truncf %4 : vector<8x256xf32> to vector<8x256xbf16>
    %6 = arith.extf %5 : vector<8x256xbf16> to vector<8x256xf32>
    %7 = arith.subf %4, %6 : vector<8x256xf32>
    %8 = arith.truncf %7 : vector<8x256xf32> to vector<8x256xbf16>
    %cst = arith.constant dense<0.000000e+00> : vector<8x256xf32>
    %9 = tpu.matmul %2, %0, %cst {dimension_numbers = #tpu.dot_dimension_numbers<[1], [0], [0], [1], [0, 0, 1, 1], [], []>} : vector<8x256xbf16>, vector<256x256xbf16>, vector<8x256xf32> -> vector<8x256xf32>
    %cst_3 = arith.constant dense<0.000000e+00> : vector<8x256xf32>
    %10 = tpu.matmul %5, %0, %cst_3 {dimension_numbers = #tpu.dot_dimension_numbers<[1], [0], [0], [1], [0, 0, 1, 1], [], []>} : vector<8x256xbf16>, vector<256x256xbf16>, vector<8x256xf32> -> vector<8x256xf32>
    %11 = arith.addf %9, %10 : vector<8x256xf32>
    %cst_4 = arith.constant dense<0.000000e+00> : vector<8x256xf32>
    %12 = tpu.matmul %8, %0, %cst_4 {dimension_numbers = #tpu.dot_dimension_numbers<[1], [0], [0], [1], [0, 0, 1, 1], [], []>} : vector<8x256xbf16>, vector<256x256xbf16>, vector<8x256xf32> -> vector<8x256xf32>
    %13 = arith.addf %11, %12 : vector<8x256xf32>
    %c0_5 = arith.constant 0 : index
    %c0_6 = arith.constant 0 : index
    %14 = vector.load %arg4[%c0_5, %c0_6] : memref<8x256xf32, #tpu.memory_space<vmem>>, vector<8x256xf32>
    tpu.vector_store %arg4[%c0_5, %c0_6], %13 {strides = array<i32>} : memref<8x256xf32, #tpu.memory_space<vmem>>, vector<8x256xf32>,
    return
  }
  func.func @transform_0(%arg0: i32, %arg1: i32) -> (i32, i32) {
    %c0_i32 = arith.constant 0 : i32
    %c0_i32_0 = arith.constant 0 : i32
    return %arg0, %c0_i32 : i32, i32
  }
  func.func @transform_1(%arg0: i32, %arg1: i32) -> (i32, i32) {
    %c0_i32 = arith.constant 0 : i32
    %c0_i32_0 = arith.constant 0 : i32
    return %c0_i32, %arg1 : i32, i32
  }
  func.func @transform_2(%arg0: i32, %arg1: i32) -> (i32, i32) {
    %c0_i32 = arith.constant 0 : i32
    return %arg0, %arg1 : i32, i32
  }
}

</mosaic_0001>

<bundles_post_ra>
// kernel: tpu_custom_call.1
= control target key start
LH: loop header
LB: loop body
LE: loop exit
PB: predicated region body
PF: predicated region fallthrough
CT: control target
= control target key end

     0   :  { %7 = vsyncpa [#allocation3], 0  ;;  %s735_s0 = inlined_call_operand.hbm [shape: f32[8,256], index: 0, kind: input, shape index: {}]   ;;  %s736_s1 = inlined_call_operand.hbm [shape: bf16[256,256], index: 1, kind: input, shape index: {}]   ;;  %s737_s2 = inlined_call_operand.hbm [shape: f32[8,256], index: 2, kind: output, shape index: {}]  }
   0x1   :  { %8 = vsyncpa [#allocation6], 0 }
   0x2   :  { %9 = vsyncpa [#allocation4], 0  ;;  %s552_s9 = smov [#allocation2]   ;;  %s553_s11 = smov [#allocation5]  }
   0x3   :  { %s16_s10 = sshll.u32 %s552_s9, 4  ;;  %s25_s12 = sshll.u32 %s553_s11, 4  ;;  %s17_s10 = int_to_ptr.vmem [resolvable:$true] %s16_s10  ;;  %s572_s12 = int_to_ptr.vmem [resolvable:$true] %s25_s12 }
   0x4   :  { %s480_s15 = scalar_lea.hbm %s735_s0, 256 }
   0x5   :  { %p481_p0 = scmp.ne.s32.totalorder %s735_s0, %s480_s15  ;;  %p484_p1 = scmp.lt.u32.totalorder %s480_s15, %s735_s0 }
   0x7   :  { %p486_p2 = pnand %p484_p1, %p481_p0 }
   0x9   :  { %489 = shalt.err (!%p486_p2)
}
   0xa   :  { %s490_s20 = scalar_lea.vmem %s17_s10, 256  ;;  %p495_p4 = scmp.lt.s32.totalorder %s17_s10, %s17_s10 }
   0xb   :  { %p491_p3 = scmp.ne.s32.totalorder %s17_s10, %s490_s20  ;;  %p496_p5 = scmp.lt.s32.totalorder %s490_s20, %s490_s20 }
   0xd   :  { %p497_p6 = por %p496_p5, %p495_p4 }
   0xf   :  { %p498_p7 = pnand %p497_p6, %p491_p3 }
  0x11   :  { %501 = shalt.err (!%p498_p7)
}
  0x12   :  { %19 = dma.hbm_to_vmem [thread:$0]  %s735_s0, 256, %s17_s10, [#allocation3]  }
  0x13   :  { %s502_s25 = scalar_lea.hbm %s736_s1, 4096 }
  0x14   :  { %p503_p8 = scmp.ne.s32.totalorder %s736_s1, %s502_s25  ;;  %p506_p9 = scmp.lt.u32.totalorder %s502_s25, %s736_s1 }
  0x16   :  { %p508_p10 = pnand %p506_p9, %p503_p8 }
  0x18   :  { %511 = shalt.err (!%p508_p10)
}
  0x19   :  { %s512_s30 = scalar_lea.vmem %s572_s12, 4096  ;;  %p517_p12 = scmp.lt.s32.totalorder %s572_s12, %s572_s12 }
  0x1a   :  { %p513_p11 = scmp.ne.s32.totalorder %s572_s12, %s512_s30  ;;  %p518_p13 = scmp.lt.s32.totalorder %s512_s30, %s512_s30 }
  0x1c   :  { %p519_p0 = por %p518_p13, %p517_p12 }
  0x1e   :  { %p520_p1 = pnand %p519_p0, %p513_p11 }
  0x20   :  { %523 = shalt.err (!%p520_p1)
}
  0x21   :  { %s554_s0 = smov 128   ;;  %s555_s3 = smov 8  }
  0x22   :  { %31 = dma.hbm_to_vmem [thread:$0]  %s736_s1, 4096, %s572_s12, [#allocation6], %s554_s0, %s554_s0, %s555_s3  }
  0x23   :  { %546 = dma.done.wait [#allocation3], 256  }
  0x24   :  { %547 = vsyncadd [#allocation3], 4294967040 }
  0x25   :  { %548 = dma.done.wait [#allocation6], 4096  }
  0x26   :  { %549 = vsyncadd [#allocation6], 4294963200  ;;  %v603_v0 = vld [vmem:[#allocation5 + $0x4] ss:$8 sps:$4 sm:$0xff]   ;;  %v605_v1 = vld [vmem:[#allocation5] ss:$8 sps:$4 sm:$0xff]  }
  0x27   :  { %287 = vmatprep.subr.bf16.mxu0 %v603_v0  ;;  %v608_v2 = vld [vmem:[#allocation5 + $0x14] ss:$8 sps:$4 sm:$0xff]   ;;  %246 = vmatprep.subr.bf16.mxu1 %v603_v0  ;;  %v612_v3 = vld [vmem:[#allocation5 + $0x10] ss:$8 sps:$4 sm:$0xff]   ;;  %v616_v4 = vld [vmem:[#allocation5 + $0x24] ss:$8 sps:$4 sm:$0xff]  }
  0x28   :  { %288 = vmatpush1.bf16.msra.mxu0 %v605_v1  ;;  %247 = vmatpush1.bf16.msra.mxu1 %v605_v1  ;;  %v620_v5 = vld [vmem:[#allocation5 + $0x20] ss:$8 sps:$4 sm:$0xff]   ;;  %v624_v6 = vld [vmem:[#allocation5 + $0x34] ss:$8 sps:$4 sm:$0xff]   ;;  %v628_v7 = vld [vmem:[#allocation5 + $0x30] ss:$8 sps:$4 sm:$0xff]  }
  0x29   :  { %289 = vmatprep.subr.bf16.mxu0 %v608_v2  ;;  %248 = vmatprep.subr.bf16.mxu1 %v608_v2  ;;  %v632_v8 = vld [vmem:[#allocation5 + $0x44] ss:$8 sps:$4 sm:$0xff]   ;;  %v636_v9 = vld [vmem:[#allocation5 + $0x40] ss:$8 sps:$4 sm:$0xff]   ;;  %v640_v10 = vld [vmem:[#allocation5 + $0x54] ss:$8 sps:$4 sm:$0xff]  }
  0x2a   :  { %v644_v11 = vld [vmem:[#allocation5 + $0x50] ss:$8 sps:$4 sm:$0xff]   ;;  %v648_v12 = vld [vmem:[#allocation5 + $0x64] ss:$8 sps:$4 sm:$0xff]   ;;  %v652_v15 = vld [vmem:[#allocation5 + $0x60] ss:$8 sps:$4 sm:$0xff]  }
  0x2b   :  { %v71_v13 = vld [vmem:[#allocation2 + $0x8] sm:$0xff]  ;;  %v664_v20 = vld [vmem:[#allocation5 + $0x84] ss:$8 sps:$4 sm:$0xff]   ;;  %v668_v22 = vld [vmem:[#allocation5 + $0x80] ss:$8 sps:$4 sm:$0xff]   ;;  %s556_s1 = smov [#allocation7]  }
  0x2c   :  { %290 = vmatpush1.bf16.msra.mxu0 %v612_v3  ;;  %249 = vmatpush1.bf16.msra.mxu1 %v612_v3  ;;  %v73_v14 = vpack.c.bf16 %v71_v13, %v71_v13  ;;  %v656_v16 = vld [vmem:[#allocation5 + $0x74] ss:$8 sps:$4 sm:$0xff]   ;;  %v660_v19 = vld [vmem:[#allocation5 + $0x70] ss:$8 sps:$4 sm:$0xff]   ;;  %v680_v25 = vld [vmem:[#allocation5 + $0xa4] ss:$8 sps:$4 sm:$0xff]  }
  0x2d   :  { %291 = vmatprep.subr.bf16.mxu0 %v616_v4  ;;  %250 = vmatprep.subr.bf16.mxu1 %v616_v4  ;;  %v672_v23 = vld [vmem:[#allocation5 + $0x94] ss:$8 sps:$4 sm:$0xff]   ;;  %v676_v24 = vld [vmem:[#allocation5 + $0x90] ss:$8 sps:$4 sm:$0xff]   ;;  %v684_v26 = vld [vmem:[#allocation5 + $0xa0] ss:$8 sps:$4 sm:$0xff]  }
  0x2e   :  { %v75_v17 = vunpack.c.l.bf16 %v73_v14  ;;  %319 = vmatprep.mubr.bf16.mxu0 %v73_v14  ;;  %v688_v27 = vld [vmem:[#allocation5 + $0xb4] ss:$8 sps:$4 sm:$0xff]   ;;  %v692_v28 = vld [vmem:[#allocation5 + $0xb0] ss:$8 sps:$4 sm:$0xff]   ;;  %v468_v29 = vld [vmem:[#allocation5 + $0xc4] ss:$8 sps:$4 sm:$0xff]  }
  0x2f   :  { %v470_v30 = vld [vmem:[#allocation5 + $0xc0] ss:$8 sps:$4 sm:$0xff]   ;;  %v471_v31 = vld [vmem:[#allocation5 + $0xd4] ss:$8 sps:$4 sm:$0xff]   ;;  %v473_v32 = vld [vmem:[#allocation5 + $0xd0] ss:$8 sps:$4 sm:$0xff]  }
  0x30   :  { %292 = vmatpush1.bf16.msra.mxu0 %v620_v5  ;;  %251 = vmatpush1.bf16.msra.mxu1 %v620_v5  ;;  %v77_v18 = vsub.f32 %v71_v13, %v75_v17  ;;  %v70_v33 = vld [vmem:[#allocation2] sm:$0xff]  ;;  %v474_v34 = vld [vmem:[#allocation5 + $0xe4] ss:$8 sps:$4 sm:$0xff]   ;;  %v476_v36 = vld [vmem:[#allocation5 + $0xe0] ss:$8 sps:$4 sm:$0xff]   ;;  %s379_s6 = sshll.u32 %s556_s1, 4  ;;  %s380_s6 = int_to_ptr.vmem [resolvable:$true] %s379_s6 }
  0x31   :  { %293 = vmatprep.subr.bf16.mxu0 %v624_v6  ;;  %252 = vmatprep.subr.bf16.mxu1 %v624_v6  ;;  %v72_v35 = vpack.c.bf16 %v70_v33, %v70_v33  ;;  %v477_v38 = vld [vmem:[#allocation5 + $0xf4] ss:$8 sps:$4 sm:$0xff]   ;;  %v479_v40 = vld [vmem:[#allocation5 + $0xf0] ss:$8 sps:$4 sm:$0xff]   ;;  %s524_s7 = scalar_lea.vmem %s380_s6, 256  ;;  %p529_p3 = scmp.lt.s32.totalorder %s380_s6, %s380_s6 }
  0x32   :  { %v79_v21 = vpack.c.bf16 %v77_v18, %v77_v18  ;;  %p525_p2 = scmp.ne.s32.totalorder %s380_s6, %s524_s7  ;;  %p530_p4 = scmp.lt.s32.totalorder %s524_s7, %s524_s7 }
  0x33   :  { %v74_v39 = vunpack.c.l.bf16 %v72_v35 }
  0x34   :  { %294 = vmatpush1.bf16.msra.mxu0 %v628_v7  ;;  %253 = vmatpush1.bf16.msra.mxu1 %v628_v7  ;;  %v81_v37 = vunpack.c.l.bf16 %v79_v21  ;;  %p531_p5 = por %p530_p4, %p529_p3 }
  0x35   :  { %295 = vmatprep.subr.bf16.mxu0 %v632_v8  ;;  %254 = vmatprep.subr.bf16.mxu1 %v632_v8  ;;  %v76_v42 = vsub.f32 %v70_v33, %v74_v39 }
  0x36   :  { %278 = vmatprep.mubr.bf16.mxu1 %v79_v21  ;;  %v83_v41 = vsub.f32 %v77_v18, %v81_v37  ;;  %p532_p6 = pnand %p531_p5, %p525_p2 }
  0x37   :  { %v78_v44 = vpack.c.bf16 %v76_v42, %v76_v42 }
  0x38   :  { %296 = vmatpush1.bf16.msra.mxu0 %v636_v9  ;;  %255 = vmatpush1.bf16.msra.mxu1 %v636_v9  ;;  %v85_v43 = vpack.c.bf16 %v83_v41, %v83_v41 }
  0x39   :  { %297 = vmatprep.subr.bf16.mxu0 %v640_v10  ;;  %256 = vmatprep.subr.bf16.mxu1 %v640_v10  ;;  %v80_v45 = vunpack.c.l.bf16 %v78_v44 }
  0x3b   :  { %v82_v46 = vsub.f32 %v76_v42, %v80_v45 }
  0x3c   :  { %298 = vmatpush1.bf16.msra.mxu0 %v644_v11  ;;  %257 = vmatpush1.bf16.msra.mxu1 %v644_v11 }
  0x3d   :  { %299 = vmatprep.subr.bf16.mxu0 %v648_v12  ;;  %258 = vmatprep.subr.bf16.mxu1 %v648_v12  ;;  %v84_v47 = vpack.c.bf16 %v82_v46, %v82_v46 }
  0x40   :  { %300 = vmatpush1.bf16.msra.mxu0 %v652_v15  ;;  %259 = vmatpush1.bf16.msra.mxu1 %v652_v15 }
  0x41   :  { %301 = vmatprep.subr.bf16.mxu0 %v656_v16  ;;  %260 = vmatprep.subr.bf16.mxu1 %v656_v16 }
  0x44   :  { %302 = vmatpush1.bf16.msra.mxu0 %v660_v19  ;;  %261 = vmatpush1.bf16.msra.mxu1 %v660_v19 }
  0x45   :  { %303 = vmatprep.subr.bf16.mxu0 %v664_v20  ;;  %262 = vmatprep.subr.bf16.mxu1 %v664_v20 }
  0x48   :  { %304 = vmatpush1.bf16.msra.mxu0 %v668_v22  ;;  %263 = vmatpush1.bf16.msra.mxu1 %v668_v22 }
  0x49   :  { %305 = vmatprep.subr.bf16.mxu0 %v672_v23  ;;  %264 = vmatprep.subr.bf16.mxu1 %v672_v23 }
  0x4c   :  { %306 = vmatpush1.bf16.msra.mxu0 %v676_v24  ;;  %265 = vmatpush1.bf16.msra.mxu1 %v676_v24 }
  0x4d   :  { %307 = vmatprep.subr.bf16.mxu0 %v680_v25  ;;  %266 = vmatprep.subr.bf16.mxu1 %v680_v25 }
  0x50   :  { %308 = vmatpush1.bf16.msra.mxu0 %v684_v26  ;;  %267 = vmatpush1.bf16.msra.mxu1 %v684_v26 }
  0x51   :  { %309 = vmatprep.subr.bf16.mxu0 %v688_v27  ;;  %268 = vmatprep.subr.bf16.mxu1 %v688_v27 }
  0x54   :  { %310 = vmatpush1.bf16.msra.mxu0 %v692_v28  ;;  %269 = vmatpush1.bf16.msra.mxu1 %v692_v28 }
  0x55   :  { %311 = vmatprep.subr.bf16.mxu0 %v468_v29  ;;  %270 = vmatprep.subr.bf16.mxu1 %v468_v29 }
  0x58   :  { %312 = vmatpush1.bf16.msra.mxu0 %v470_v30  ;;  %271 = vmatpush1.bf16.msra.mxu1 %v470_v30 }
  0x59   :  { %313 = vmatprep.subr.bf16.mxu0 %v471_v31  ;;  %272 = vmatprep.subr.bf16.mxu1 %v471_v31 }
  0x5c   :  { %314 = vmatpush1.bf16.msra.mxu0 %v473_v32  ;;  %273 = vmatpush1.bf16.msra.mxu1 %v473_v32 }
  0x5d   :  { %315 = vmatprep.subr.bf16.mxu0 %v474_v34  ;;  %274 = vmatprep.subr.bf16.mxu1 %v474_v34 }
  0x60   :  { %316 = vmatpush1.bf16.msra.mxu0 %v476_v36  ;;  %275 = vmatpush1.bf16.msra.mxu1 %v476_v36 }
  0x61   :  { %317 = vmatprep.subr.bf16.mxu0 %v477_v38  ;;  %276 = vmatprep.subr.bf16.mxu1 %v477_v38 }
  0x64   :  { %318 = vmatpush1.bf16.msra.mxu0 %v479_v40  ;;  %277 = vmatpush1.bf16.msra.mxu1 %v479_v40 }
  0x65   :  { %328 = vmatprep.subr.bf16.mxu0 %v603_v0 }
  0x67   :  { %320 = vmatmul.mubr.bf16.vlgmr.msra.gmra.mrb[0].mxu0 %v72_v35  ;;  %279 = vmatmul.mubr.bf16.vlgmr.msra.gmra.mrb[0].mxu1 %v78_v44 }
  0x68   :  { %329 = vmatpush1.bf16.msra.mxu0 %v605_v1  ;;  %360 = vmatprep.mubr.bf16.mxu0 %v85_v43 }
  0x69   :  { %330 = vmatprep.subr.bf16.mxu0 %v608_v2 }
  0x6c   :  { %331 = vmatpush1.bf16.msra.mxu0 %v612_v3 }
  0x6d   :  { %332 = vmatprep.subr.bf16.mxu0 %v616_v4 }
  0x70   :  { %333 = vmatpush1.bf16.msra.mxu0 %v620_v5 }
  0x71   :  { %334 = vmatprep.subr.bf16.mxu0 %v624_v6 }
  0x74   :  { %335 = vmatpush1.bf16.msra.mxu0 %v628_v7 }
  0x75   :  { %336 = vmatprep.subr.bf16.mxu0 %v632_v8 }
  0x78   :  { %337 = vmatpush1.bf16.msra.mxu0 %v636_v9 }
  0x79   :  { %338 = vmatprep.subr.bf16.mxu0 %v640_v10 }
  0x7c   :  { %339 = vmatpush1.bf16.msra.mxu0 %v644_v11 }
  0x7d   :  { %340 = vmatprep.subr.bf16.mxu0 %v648_v12 }
  0x80   :  { %341 = vmatpush1.bf16.msra.mxu0 %v652_v15 }
  0x81   :  { %342 = vmatprep.subr.bf16.mxu0 %v656_v16 }
  0x84   :  { %343 = vmatpush1.bf16.msra.mxu0 %v660_v19 }
  0x85   :  { %344 = vmatprep.subr.bf16.mxu0 %v664_v20 }
  0x88   :  { %345 = vmatpush1.bf16.msra.mxu0 %v668_v22 }
  0x89   :  { %346 = vmatprep.subr.bf16.mxu0 %v672_v23 }
  0x8c   :  { %347 = vmatpush1.bf16.msra.mxu0 %v676_v24 }
  0x8d   :  { %348 = vmatprep.subr.bf16.mxu0 %v680_v25 }
  0x90   :  { %349 = vmatpush1.bf16.msra.mxu0 %v684_v26 }
  0x91   :  { %350 = vmatprep.subr.bf16.mxu0 %v688_v27 }
  0x94   :  { %351 = vmatpush1.bf16.msra.mxu0 %v692_v28 }
  0x95   :  { %352 = vmatprep.subr.bf16.mxu0 %v468_v29 }
  0x98   :  { %353 = vmatpush1.bf16.msra.mxu0 %v470_v30 }
  0x99   :  { %354 = vmatprep.subr.bf16.mxu0 %v471_v31 }
  0x9c   :  { %355 = vmatpush1.bf16.msra.mxu0 %v473_v32 }
  0x9d   :  { %356 = vmatprep.subr.bf16.mxu0 %v474_v34 }
  0xa0   :  { %357 = vmatpush1.bf16.msra.mxu0 %v476_v36 }
  0xa1   :  { %358 = vmatprep.subr.bf16.mxu0 %v477_v38 }
  0xa4   :  { %359 = vmatpush1.bf16.msra.mxu0 %v479_v40 }
  0xa7   :  { %361 = vmatmul.mubr.bf16.vlgmr.msra.gmra.mrb[0].mxu0 %v84_v47 }
 0x13a   :  { %v280_v48 = vpop.f32.mrb[0].mxu1 }
 0x13b   :  { %v282_v49 = vpop.f32.mrb[1].mxu1 }
 0x13c   :  { %v284_v50 = vpop.f32.mrb[2].mxu1 }
 0x13d   :  { %v285_v51 = vpop.f32.mrb[3].mxu1 }
 0x17a   :  { %v362_v52 = vpop.f32.mrb[0].mxu0 }
 0x17b   :  { %v421_v53 = vadd.f32 %v362_v52, %v280_v48  ;;  %v364_v54 = vpop.f32.mrb[1].mxu0 }
 0x17c   :  { %v422_v55 = vadd.f32 %v364_v54, %v282_v49  ;;  %v366_v56 = vpop.f32.mrb[2].mxu0 }
 0x17d   :  { %371 = vst [vmem:[#allocation7] sm:$0xff] %v421_v53  ;;  %v367_v57 = vpop.f32.mrb[3].mxu0 }
 0x17e   :  { %372 = vst [vmem:[#allocation7 + $0x8] sm:$0xff] %v422_v55 }
 0x17f   :  { %535 = shalt.err (!%p532_p6)
}
 0x180   :  { %s536_s10 = scalar_lea.hbm %s737_s2, 256 }
 0x181   :  { %p537_p7 = scmp.ne.s32.totalorder %s737_s2, %s536_s10  ;;  %p540_p8 = scmp.lt.u32.totalorder %s536_s10, %s737_s2 }
 0x183   :  { %p542_p9 = pnand %p540_p8, %p537_p7 }
 0x185   :  { %545 = shalt.err (!%p542_p9)
}
 0x186   :  { %382 = dma.vmem_to_hbm [thread:$0]  %s380_s6, 256, %s737_s2, [#allocation4]  }
 0x187   :  { %550 = dma.done.wait [#allocation4], 256  }
 0x188   :  { %551 = vsyncadd [#allocation4], 4294967040 }
 0x189   :  { %386 = vsyncpa [#allocation3], 1 }
 0x18a   :  { %387 = vsyncpa [#allocation6], 1 }
 0x18b   :  { %388 = vsyncpa [#allocation4], 1 }

</bundles_post_ra>
